<compile_context>
chip_gen: v6e
topology: v6e:2x2x1
jax: 0.10.0
libtpu: 0.0.40
codegen_flags: <defaults>
</compile_context>

<pallas_src>
import jax
import jax.numpy as jnp
from jax import lax
from jax.experimental import pallas as pl
from jax.experimental.pallas import tpu as pltpu

BN_EPS = 1e-5   # nn.BatchNorm1d default eps


def _st_kernel(shift_ref, attn_ref, tgt_ref, st_ref):
    """One batch tile: attn (TB, 8, L), flat target (TB, 64) -> st (TB, 1)."""
    shift = shift_ref[0]                                     # 0.25 - 250*global_mean (SMEM, f32)

    # bin = sigmoid(5*((attn-mean)*100) + 0.5)/5 = 0.1*(tanh(250*attn + shift) + 1).
    # Keep t = 10*bin (values in [0, 2]) and fold the 0.1 factors into the constants below.
    t = jnp.tanh(attn_ref[...].astype(jnp.float32) * 250.0 + shift) + 1.0      # (TB, 8, L)

    # IoU (verified identity vs the reference):
    #   inter = 25<bin_i,bin_j>            = 0.25<t_i,t_j>
    #   union = 5*(Sbin_i+Sbin_j) - inter  = 0.5*(St_i+St_j) - inter
    inter = 0.25 * jnp.einsum('bil,bjl->bij', t, t,
                              preferred_element_type=jnp.float32)               # (TB, 8, 8)
    rs = 0.5 * jnp.sum(t, axis=-1)                                              # (TB, 8)
    union = rs[:, :, None] + rs[:, None, :] - inter
    sim = inter / union                 # exact divide (tiny tensor; matches reference numerics)

    tgt = tgt_ref[...].astype(jnp.float32) * 100.0           # (TB, 64), flat index k = 8*i + j

    # st[b] = sum over the lower triangle (j <= i) of |sim - 100*tgt|.
    # Static 8-way unroll: only cheap static lane slices and tiny reductions, no reshapes.
    st = jnp.zeros((t.shape[0], 1), jnp.float32)
    for i in range(8):
        d = jnp.abs(sim[:, i, : i + 1] - tgt[:, 8 * i : 8 * i + i + 1])         # (TB, i+1)
        st = st + jnp.sum(d, axis=1, keepdims=True)
    st_ref[...] = st                    # natural (sublane-major) layout -> no relayout on store


def _round_up(x, m):
    return ((x + m - 1) // m) * m


def _cdiv(a, b):
    return -(-a // b)


def _chip_budgets():
    """Generation-aware budgets: (attn tile bytes, vmem_limit_bytes, min grid tiles).

    Conservative fallback (small-VMEM settings) works on every TPU generation.
    """
    vmem_cap = 64 << 20                      # assume smallest (v7x-class) VMEM if detection fails
    try:
        info = pltpu.get_tpu_info()
        vmem_cap = int(getattr(info, "vmem_capacity_bytes", vmem_cap))
    except Exception:
        pass
    if vmem_cap <= (64 << 20):               # v7x-class: 64 MiB VMEM, 2 TensorCores
        return (2 << 20), (40 << 20), 2
    return (4 << 20), (64 << 20), 1          # v5e / v6e: 128 MiB VMEM, 1 TensorCore


def get_rep(attn_maps, target_matrix, fc_w, fc_b, *, tile_b=None):
    """Pallas forward of GetRep: attn_maps (B,8,L), target_matrix (B,8,8) -> (B,3)."""
    B, C, L = attn_maps.shape
    assert C == 8, "Conv1d(in_channels=8, groups=8) requires channel dim == 8"
    itemsize = attn_maps.dtype.itemsize

    attn_budget, vmem_limit, min_tiles = _chip_budgets()

    # ---- batch tile: large enough to amortize the ~0.35us per-grid-step overhead, small enough
    # that 2x attn buffers + ~2 attn-tile-sized f32 temporaries + 2x (TB,64) target buffers fit.
    if tile_b is None:
        tile_b = max(8, attn_budget // (8 * L * itemsize))
        tile_b = (tile_b // 128) * 128 if tile_b >= 128 else (tile_b // 8) * 8
    tile_b = int(max(8, min(int(tile_b), _round_up(B, 8))))
    tile_b = max(8, (tile_b // 8) * 8)
    # v7x: keep at least `min_tiles` grid steps so both TensorCores get a "parallel" tile.
    while min_tiles > 1 and _cdiv(B, tile_b) < min_tiles and tile_b > 8:
        tile_b = max(8, ((tile_b // 2) // 8) * 8)
    n_tiles = _cdiv(B, tile_b)
    b_pad = n_tiles * tile_b

    # ---- pass 0: global mean (couples the whole batch) -> one scalar folded into the tanh arg.
    mean = jnp.mean(attn_maps.astype(jnp.float32))
    shift = (0.25 - 250.0 * mean).astype(jnp.float32).reshape(1)

    # ---- layout prep (free XLA work): flatten target to (B, 64) so its HBM slice per tile is
    # contiguous and its VMEM tile is not lane-padded 16x.  Pad batch to the tile multiple;
    # padded rows are computed (finite) and discarded before BatchNorm.
    tgt_flat = target_matrix.reshape(B, 64)
    if b_pad != B:
        attn_p = jnp.pad(attn_maps, ((0, b_pad - B), (0, 0), (0, 0)))
        tgt_p = jnp.pad(tgt_flat, ((0, b_pad - B), (0, 0)))
    else:
        attn_p, tgt_p = attn_maps, tgt_flat

    cost = pl.CostEstimate(
        flops=int(b_pad * (2 * 64 * L + 12 * 8 * L + 10 * 64)),
        transcendentals=int(b_pad * 8 * L),
        bytes_accessed=int(b_pad * 8 * L * itemsize
                           + b_pad * 64 * tgt_p.dtype.itemsize
                           + b_pad * 4),
    )

    st_pad = pl.pallas_call(
        _st_kernel,
        out_shape=jax.ShapeDtypeStruct((b_pad, 1), jnp.float32),
        grid_spec=pltpu.PrefetchScalarGridSpec(
            num_scalar_prefetch=1,                                        # `shift` -> SMEM
            grid=(n_tiles,),
            in_specs=[
                pl.BlockSpec((tile_b, 8, L), lambda b, _s: (b, 0, 0)),    # attn batch tile
                pl.BlockSpec((tile_b, 64), lambda b, _s: (b, 0)),         # flat target tile
            ],
            out_specs=pl.BlockSpec((tile_b, 1), lambda b, _s: (b, 0)),
        ),
        compiler_params=pltpu.CompilerParams(
            dimension_semantics=("parallel",),        # independent batch tiles (v7x megacore)
            vmem_limit_bytes=vmem_limit,
        ),
        cost_estimate=cost,
    )(shift, attn_p, tgt_p)

    st = st_pad[:B, 0]                                                    # (B,)

    # ---- BatchNorm1d(1, affine=False), training mode (couples the batch) -> tiny, plain JAX.
    mu = jnp.mean(st)
    var = jnp.mean(jnp.square(st - mu))
    stn = (st - mu) * lax.rsqrt(var + BN_EPS)

    # TODO(synk): the reference fc1 (in_features=128) is shape-incompatible with the (B, 1)
    # batch-norm output it is fed; as before we apply only its first input-feature column so
    # the op remains a well-defined affine map.
    w0 = fc_w[:, 0].astype(jnp.float32)                                   # (3,)
    return stn[:, None] * w0[None, :] + fc_b.reshape(1, -1).astype(jnp.float32)


def _get_rep_ref(attn, tgt, fc_w, fc_b):
    """Pure-JAX mirror of the PyTorch forward (same math, no Pallas) for a sanity check."""
    mean = jnp.mean(jnp.mean(attn, axis=2, keepdims=True))
    x = (attn - mean) * 100.0
    bm = jax.nn.sigmoid(5.0 * x + 0.5) / 5.0
    inter = 25.0 * jnp.einsum('bil,bjl->bij', bm, bm)
    s = jnp.sum(bm, axis=-1)
    union = 5.0 * (s[:, :, None] + s[:, None, :]) - inter
    sim = inter / union
    tri = (jnp.arange(8)[None, :] <= jnp.arange(8)[:, None])[None]
    st = jnp.sum(jnp.where(tri, jnp.abs(sim - 100.0 * tgt), 0.0), axis=(1, 2))
    mu = jnp.mean(st)
    var = jnp.mean(jnp.square(st - mu))
    stn = (st - mu) * lax.rsqrt(var + BN_EPS)
    return stn[:, None] * fc_w[:, 0][None, :] + fc_b[None, :]


if __name__ == "__main__":
    key = jax.random.PRNGKey(0)
    k1, k2, k3, k4 = jax.random.split(key, 4)

    B, C, L = 16, 8, 256                       # channels fixed at 8 by the module; small L
    attn_maps = jax.random.normal(k1, (B, C, L), jnp.float32)
    target_matrix = jax.random.uniform(k2, (B, C, C), jnp.float32)

    # Deterministic synthetic fc1 parameters (shapes from nn.Linear(128, 3)).
    fc_w = jax.random.normal(k3, (3, 128), jnp.float32) / jnp.sqrt(128.0)
    fc_b = jax.random.normal(k4, (3,), jnp.float32) * 0.01

    out = get_rep(attn_maps, target_matrix, fc_w, fc_b)
    jax.block_until_ready(out)
    assert out.shape == (B, 3)

    ref = _get_rep_ref(attn_maps, target_matrix, fc_w, fc_b)
    assert bool(jnp.allclose(out, ref, rtol=2e-2, atol=2e-2)), "kernel deviates from JAX reference"

    print("KERNEL_OK")
</pallas_src>

<mosaic_0001>
module attributes {stable_mosaic.version = 11 : i64} {
  func.func @_st_kernel(%arg0: i32, %arg1: memref<1xf32, #tpu.memory_space<smem>>, %arg2: memref<8x8x256xf32, #tpu.memory_space<vmem>>, %arg3: memref<8x64xf32, #tpu.memory_space<vmem>>, %arg4: memref<8x1xf32, #tpu.memory_space<vmem>>) attributes {dimension_semantics = [#tpu.dimension_semantics<parallel>], iteration_bounds = array<i64: 2>, scalar_prefetch = 1 : i64, scratch_operands = 0 : i64, tpu.core_type = #tpu.core_type<tc>, window_params = [{transform_indices = @transform_0, window_bounds = array<i64: 8, 8, 256>}, {transform_indices = @transform_1, window_bounds = array<i64: 8, 64>}, {transform_indices = @transform_2, window_bounds = array<i64: 8, 1>}]} {
    %c0 = arith.constant 0 : index
    %0 = memref.load %arg1[%c0] : memref<1xf32, #tpu.memory_space<smem>>
    %c0_0 = arith.constant 0 : index
    %c0_1 = arith.constant 0 : index
    %c0_2 = arith.constant 0 : index
    %1 = vector.load %arg2[%c0_0, %c0_1, %c0_2] : memref<8x8x256xf32, #tpu.memory_space<vmem>>, vector<8x8x256xf32>
    %cst = arith.constant 2.500000e+02 : f32
    %2 = vector.broadcast %cst : f32 to vector<8x8x256xf32>
    %3 = arith.mulf %1, %2 : vector<8x8x256xf32>
    %4 = vector.broadcast %0 : f32 to vector<8x8x256xf32>
    %5 = arith.addf %3, %4 : vector<8x8x256xf32>
    %6 = math.tanh %5 : vector<8x8x256xf32>
    %cst_3 = arith.constant 1.000000e+00 : f32
    %7 = vector.broadcast %cst_3 : f32 to vector<8x8x256xf32>
    %8 = arith.addf %6, %7 : vector<8x8x256xf32>
    "tpu.trace_start"() <{level = 10 : i32, message = "bil,bjl->bij"}> : () -> ()
    %cst_4 = arith.constant dense<0.000000e+00> : vector<8x8x8xf32>
    %9 = tpu.matmul %8, %8, %cst_4 {dimension_numbers = #tpu.dot_dimension_numbers<[2], [2], [1], [1], [0, 0, 0, 1, 1, 1], [0], [0]>} : vector<8x8x256xf32>, vector<8x8x256xf32>, vector<8x8x8xf32> -> vector<8x8x8xf32>
    "tpu.trace_stop"() : () -> ()
    %cst_5 = arith.constant 2.500000e-01 : f32
    %10 = vector.broadcast %cst_5 : f32 to vector<8x8x8xf32>
    %11 = arith.mulf %10, %9 : vector<8x8x8xf32>
    %cst_6 = arith.constant dense<0.000000e+00> : vector<8x8xf32>
    %12 = vector.multi_reduction <add>, %8, %cst_6 [2] : vector<8x8x256xf32> to vector<8x8xf32>
    %cst_7 = arith.constant 5.000000e-01 : f32
    %13 = vector.broadcast %cst_7 : f32 to vector<8x8xf32>
    %14 = arith.mulf %13, %12 : vector<8x8xf32>
    %15 = vector.shape_cast %14 : vector<8x8xf32> to vector<8x8x1xf32>
    %16 = vector.shape_cast %14 : vector<8x8xf32> to vector<8x1x8xf32>
    %17 = vector.broadcast %15 : vector<8x8x1xf32> to vector<8x8x8xf32>
    %18 = vector.broadcast %16 : vector<8x1x8xf32> to vector<8x8x8xf32>
    %19 = arith.addf %17, %18 : vector<8x8x8xf32>
    %20 = arith.subf %19, %11 : vector<8x8x8xf32>
    %21 = arith.divf %11, %20 : vector<8x8x8xf32>
    %c0_8 = arith.constant 0 : index
    %c0_9 = arith.constant 0 : index
    %22 = vector.load %arg3[%c0_8, %c0_9] : memref<8x64xf32, #tpu.memory_space<vmem>>, vector<8x64xf32>
    %cst_10 = arith.constant 1.000000e+02 : f32
    %23 = vector.broadcast %cst_10 : f32 to vector<8x64xf32>
    %24 = arith.mulf %22, %23 : vector<8x64xf32>
    %cst_11 = arith.constant 0.000000e+00 : f32
    %25 = vector.broadcast %cst_11 : f32 to vector<8x1xf32>
    %26 = vector.extract_strided_slice %21 {offsets = [0, 0, 0], sizes = [8, 1, 1], strides = [1, 1, 1]} : vector<8x8x8xf32> to vector<8x1x1xf32>
    %27 = vector.shape_cast %26 : vector<8x1x1xf32> to vector<8x1xf32>
    %28 = vector.extract_strided_slice %24 {offsets = [0, 0], sizes = [8, 1], strides = [1, 1]} : vector<8x64xf32> to vector<8x1xf32>
    %29 = arith.subf %27, %28 : vector<8x1xf32>
    %30 = math.absf %29 : vector<8x1xf32>
    %cst_12 = arith.constant dense<0.000000e+00> : vector<8xf32>
    %31 = vector.multi_reduction <add>, %30, %cst_12 [1] : vector<8x1xf32> to vector<8xf32>
    %32 = vector.shape_cast %31 : vector<8xf32> to vector<8x1xf32>
    %33 = arith.addf %25, %32 : vector<8x1xf32>
    %34 = vector.extract_strided_slice %21 {offsets = [0, 1, 0], sizes = [8, 1, 2], strides = [1, 1, 1]} : vector<8x8x8xf32> to vector<8x1x2xf32>
    %35 = vector.shape_cast %34 : vector<8x1x2xf32> to vector<8x2xf32>
    %36 = vector.extract_strided_slice %24 {offsets = [0, 8], sizes = [8, 2], strides = [1, 1]} : vector<8x64xf32> to vector<8x2xf32>
    %37 = arith.subf %35, %36 : vector<8x2xf32>
    %38 = math.absf %37 : vector<8x2xf32>
    %cst_13 = arith.constant dense<0.000000e+00> : vector<8xf32>
    %39 = vector.multi_reduction <add>, %38, %cst_13 [1] : vector<8x2xf32> to vector<8xf32>
    %40 = vector.shape_cast %39 : vector<8xf32> to vector<8x1xf32>
    %41 = arith.addf %33, %40 : vector<8x1xf32>
    %42 = vector.extract_strided_slice %21 {offsets = [0, 2, 0], sizes = [8, 1, 3], strides = [1, 1, 1]} : vector<8x8x8xf32> to vector<8x1x3xf32>
    %43 = vector.shape_cast %42 : vector<8x1x3xf32> to vector<8x3xf32>
    %44 = vector.extract_strided_slice %24 {offsets = [0, 16], sizes = [8, 3], strides = [1, 1]} : vector<8x64xf32> to vector<8x3xf32>
    %45 = arith.subf %43, %44 : vector<8x3xf32>
    %46 = math.absf %45 : vector<8x3xf32>
    %cst_14 = arith.constant dense<0.000000e+00> : vector<8xf32>
    %47 = vector.multi_reduction <add>, %46, %cst_14 [1] : vector<8x3xf32> to vector<8xf32>
    %48 = vector.shape_cast %47 : vector<8xf32> to vector<8x1xf32>
    %49 = arith.addf %41, %48 : vector<8x1xf32>
    %50 = vector.extract_strided_slice %21 {offsets = [0, 3, 0], sizes = [8, 1, 4], strides = [1, 1, 1]} : vector<8x8x8xf32> to vector<8x1x4xf32>
    %51 = vector.shape_cast %50 : vector<8x1x4xf32> to vector<8x4xf32>
    %52 = vector.extract_strided_slice %24 {offsets = [0, 24], sizes = [8, 4], strides = [1, 1]} : vector<8x64xf32> to vector<8x4xf32>
    %53 = arith.subf %51, %52 : vector<8x4xf32>
    %54 = math.absf %53 : vector<8x4xf32>
    %cst_15 = arith.constant dense<0.000000e+00> : vector<8xf32>
    %55 = vector.multi_reduction <add>, %54, %cst_15 [1] : vector<8x4xf32> to vector<8xf32>
    %56 = vector.shape_cast %55 : vector<8xf32> to vector<8x1xf32>
    %57 = arith.addf %49, %56 : vector<8x1xf32>
    %58 = vector.extract_strided_slice %21 {offsets = [0, 4, 0], sizes = [8, 1, 5], strides = [1, 1, 1]} : vector<8x8x8xf32> to vector<8x1x5xf32>
    %59 = vector.shape_cast %58 : vector<8x1x5xf32> to vector<8x5xf32>
    %60 = vector.extract_strided_slice %24 {offsets = [0, 32], sizes = [8, 5], strides = [1, 1]} : vector<8x64xf32> to vector<8x5xf32>
    %61 = arith.subf %59, %60 : vector<8x5xf32>
    %62 = math.absf %61 : vector<8x5xf32>
    %cst_16 = arith.constant dense<0.000000e+00> : vector<8xf32>
    %63 = vector.multi_reduction <add>, %62, %cst_16 [1] : vector<8x5xf32> to vector<8xf32>
    %64 = vector.shape_cast %63 : vector<8xf32> to vector<8x1xf32>
    %65 = arith.addf %57, %64 : vector<8x1xf32>
    %66 = vector.extract_strided_slice %21 {offsets = [0, 5, 0], sizes = [8, 1, 6], strides = [1, 1, 1]} : vector<8x8x8xf32> to vector<8x1x6xf32>
    %67 = vector.shape_cast %66 : vector<8x1x6xf32> to vector<8x6xf32>
    %68 = vector.extract_strided_slice %24 {offsets = [0, 40], sizes = [8, 6], strides = [1, 1]} : vector<8x64xf32> to vector<8x6xf32>
    %69 = arith.subf %67, %68 : vector<8x6xf32>
    %70 = math.absf %69 : vector<8x6xf32>
    %cst_17 = arith.constant dense<0.000000e+00> : vector<8xf32>
    %71 = vector.multi_reduction <add>, %70, %cst_17 [1] : vector<8x6xf32> to vector<8xf32>
    %72 = vector.shape_cast %71 : vector<8xf32> to vector<8x1xf32>
    %73 = arith.addf %65, %72 : vector<8x1xf32>
    %74 = vector.extract_strided_slice %21 {offsets = [0, 6, 0], sizes = [8, 1, 7], strides = [1, 1, 1]} : vector<8x8x8xf32> to vector<8x1x7xf32>
    %75 = vector.shape_cast %74 : vector<8x1x7xf32> to vector<8x7xf32>
    %76 = vector.extract_strided_slice %24 {offsets = [0, 48], sizes = [8, 7], strides = [1, 1]} : vector<8x64xf32> to vector<8x7xf32>
    %77 = arith.subf %75, %76 : vector<8x7xf32>
    %78 = math.absf %77 : vector<8x7xf32>
    %cst_18 = arith.constant dense<0.000000e+00> : vector<8xf32>
    %79 = vector.multi_reduction <add>, %78, %cst_18 [1] : vector<8x7xf32> to vector<8xf32>
    %80 = vector.shape_cast %79 : vector<8xf32> to vector<8x1xf32>
    %81 = arith.addf %73, %80 : vector<8x1xf32>
    %82 = vector.extract_strided_slice %21 {offsets = [0, 7, 0], sizes = [8, 1, 8], strides = [1, 1, 1]} : vector<8x8x8xf32> to vector<8x1x8xf32>
    %83 = vector.shape_cast %82 : vector<8x1x8xf32> to vector<8x8xf32>
    %84 = vector.extract_strided_slice %24 {offsets = [0, 56], sizes = [8, 8], strides = [1, 1]} : vector<8x64xf32> to vector<8x8xf32>
    %85 = arith.subf %83, %84 : vector<8x8xf32>
    %86 = math.absf %85 : vector<8x8xf32>
    %cst_19 = arith.constant dense<0.000000e+00> : vector<8xf32>
    %87 = vector.multi_reduction <add>, %86, %cst_19 [1] : vector<8x8xf32> to vector<8xf32>
    %88 = vector.shape_cast %87 : vector<8xf32> to vector<8x1xf32>
    %89 = arith.addf %81, %88 : vector<8x1xf32>
    %c0_20 = arith.constant 0 : index
    %c0_21 = arith.constant 0 : index
    %90 = vector.load %arg4[%c0_20, %c0_21] : memref<8x1xf32, #tpu.memory_space<vmem>>, vector<8x1xf32>
    tpu.vector_store %arg4[%c0_20, %c0_21], %89 {strides = array<i32>} : memref<8x1xf32, #tpu.memory_space<vmem>>, vector<8x1xf32>,
    return
  }
  func.func @transform_0(%arg0: i32, %arg1: memref<1xf32, #tpu.memory_space<smem>>) -> (i32, i32, i32) {
    %c0_i32 = arith.constant 0 : i32
    %c0_i32_0 = arith.constant 0 : i32
    %c0_i32_1 = arith.constant 0 : i32
    return %arg0, %c0_i32, %c0_i32_0 : i32, i32, i32
  }
  func.func @transform_1(%arg0: i32, %arg1: memref<1xf32, #tpu.memory_space<smem>>) -> (i32, i32) {
    %c0_i32 = arith.constant 0 : i32
    %c0_i32_0 = arith.constant 0 : i32
    return %arg0, %c0_i32 : i32, i32
  }
  func.func @transform_2(%arg0: i32, %arg1: memref<1xf32, #tpu.memory_space<smem>>) -> (i32, i32) {
    %c0_i32 = arith.constant 0 : i32
    %c0_i32_0 = arith.constant 0 : i32
    return %arg0, %c0_i32 : i32, i32
  }
}

</mosaic_0001>

<bundles_post_ra>
// kernel: tpu_custom_call.1
= control target key start
LH: loop header
LB: loop body
LE: loop exit
PB: predicated region body
PF: predicated region fallthrough
CT: control target
= control target key end

     0   :  { %s2695_s0 = inlined_call_operand.<no memory space> [shape: f32[1], index: 0, kind: input, shape index: {}]   ;;  %s2696_s1 = inlined_call_operand.hbm [shape: f32[16,8,256], index: 1, kind: input, shape index: {}]   ;;  %s2697_s2 = inlined_call_operand.hbm [shape: f32[16,64], index: 2, kind: input, shape index: {}]   ;;  %s2698_s3 = inlined_call_operand.vmem [shape: f32[16,1], index: 3, kind: output, shape index: {}]  }
   0x1   :  { %8 = sst [smem:[#allocation3]] %s2695_s0 }
   0x2   :  { %9 = vsyncpa [#allocation5], 0 }
   0x3   :  { %11 = vsyncpa [#allocation5 + $0x1], 0 }
   0x4   :  { %12 = vsyncpa [#allocation7], 0 }
   0x5   :  { %14 = vsyncpa [#allocation7 + $0x1], 0  ;;  %s2105_s14 = smov 0   ;;  %s2107_s15 = smov 0  }
   0x6   :  { %s2109_s16 = smov 0   ;;  %s2111_s17 = smov 0  }
   0x7 LB: > { %s2124_s0 = sadd.s32 4294967295, %s2069_s17   ;;  %s2127_s18 = sadd.s32 1, %s2069_s17   ;;  %s2069_s17 = sphi %s2111_s17, %s2709_s17   ;;  %s2065_s16 = sphi %s2109_s16, %s2708_s16   ;;  %s2061_s15 = sphi %s2107_s15, %s2707_s15   ;;  %s2057_s14 = sphi %s2105_s14, %s2706_s14  }
   0x8   : > { %s24_s19 = ssub.s32 %s2069_s17, %s2127_s18  ;;  %s27_s20 = sadd.s32 1, %s2065_s16 }
   0x9   : > { %p25_p0 = scmp.eq.s32.totalorder %s24_s19, 0  ;;  %p34_p1 = scmp.ne.s32.totalorder %s2065_s16, %s2061_s15 }
   0xa   : > { %p35_p2 = scmp.eq.s32.totalorder %s2069_s17, 0  ;;  %p40_p3 = scmp.ne.s32.totalorder %s2061_s15, %s2057_s14 }
   0xb   : > { %s2137_s21 = scalar_select %p25_p0, %s2065_s16, %s27_s20  }
   0xc   : > { %p36_p4 = por %p35_p2, %p34_p1  ;;  %p41_p5 = scmp.eq.s32.totalorder %s2124_s0, 0 }
   0xd   : > { %p1885_p6 = scmp.lt.s32.totalorder %s2069_s17, 2  ;;  %s2146_s23 = sand.u32 1, %s2065_s16  }
   0xe   : > { %p2141_p7 = por %p41_p5, %p40_p3  ;;  %s1860_s24 = sshll.u32 %s2146_s23, 7 }
   0xf   : > { %s1873_s25 = sshll.u32 %s2069_s17, 11  ;;  %s120_s29 = scalar_lea.vmem [#allocation4], %s1860_s24 }
  0x10   : > { %s2700_s22 = scalar_select %p2141_p7, 1, 0 }
  0x11   : > { %s2153_s28 = scalar_lea.hbm %s2696_s1, %s1873_s25  ;;  %s128_s30 = sshll.u32 %s120_s29, 4  ;;  %s2155_s30 = int_to_ptr.vmem [resolvable:$true] %s128_s30 }
  0x12   : > { %p2157_p8 = pnand %p1885_p6, %p36_p4  ;;  %s117_s5 = scalar_lea.sflag [#allocation5], %s2146_s23 }
  0x13   : > { %s1975_s6 = scalar_lea.hbm %s2153_s28, 2048  ;;  %s1980_s9 = scalar_lea.hbm %s2696_s1, 4096 }
  0x14   : > { %p1976_p10 = scmp.ne.s32.totalorder %s2153_s28, %s1975_s6  ;;  %p1977_p11 = pneg %p2157_p8 }
  0x15   : > { %p1981_p0 = scmp.lt.s32.totalorder %s2153_s28, %s2696_s1  ;;  %p1982_p1 = scmp.lt.s32.totalorder %s1980_s9, %s1975_s6 }
  0x16   : > { %p1978_p12 = pnand %p1977_p11, %p1976_p10 }
  0x17   : > { %p1983_p2 = por %p1982_p1, %p1981_p0 }
  0x18   : > { %p1979_p13 = pneg %p1978_p12 }
  0x1a   : > { %p1984_p3 = pnand %p1983_p2, %p1979_p13 }
  0x1c   : > { %1987 = shalt.err (!%p1984_p3)
}
  0x1d   : > { %s1988_s12 = scalar_lea.vmem %s2155_s30, 2048  ;;  %s2071_s13 = smov [#allocation4]  }
  0x1e   : > { %p1989_p4 = scmp.ne.s32.totalorder %s2155_s30, %s1988_s12  ;;  %s1993_s14 = sshll.u32 %s2071_s13, 4  ;;  %s1994_s14 = int_to_ptr.vmem [resolvable:$false] %s1993_s14 }
  0x1f   : > { %s1995_s19 = scalar_lea.vmem %s1994_s14, 4096  ;;  %p1996_p10 = scmp.lt.s32.totalorder %s2155_s30, %s1994_s14 }
  0x20   : > { %p1991_p5 = pnand %p1989_p4, %p1977_p11  ;;  %p1997_p12 = scmp.lt.s32.totalorder %s1995_s19, %s1988_s12 }
  0x22   : > { %p1992_p6 = pneg %p1991_p5  ;;  %p1998_p9 = por %p1997_p12, %p1996_p10 }
  0x24   : > { %p1999_p0 = pnand %p1998_p9, %p1992_p6 }
  0x26   : > { %2002 = shalt.err (!%p1999_p0)
}
  0x27   : > { %s2072_s20 = smov 256   ;;  %s2073_s24 = smov 16  }
  0x28   : > { %1881 = dma.hbm_to_vmem [thread:$0]  (!%p2157_p8), %s2153_s28, 2048, %s2155_s30, %s117_s5, %s2072_s20, %s2072_s20, %s2073_s24  }
  0x29   : > { %p154_p13 = scmp.lt.s32.totalorder %s2069_s17, 3  ;;  %s1864_s25 = sshll.u32 %s2146_s23, 3 }
  0x2a   : > { %s1865_s26 = sshll.u32 %s2069_s17, 7  ;;  %p2702_p9 = scmp.ge.s32.totalorder %s2069_s17, 1 }
  0x2b   : > { %s2201_s7 = scalar_lea.hbm %s2697_s2, %s1865_s26  ;;  %s142_s8 = scalar_lea.vmem [#allocation6], %s1864_s25 }
  0x2c   : > { %p2194_p1 = pnand %p2702_p9, %p154_p13  ;;  %s149_s9 = sshll.u32 %s142_s8, 4  ;;  %s150_s9 = int_to_ptr.vmem [resolvable:$true] %s149_s9 }
  0x2d   : > { %s139_s28 = scalar_lea.sflag [#allocation7], %s2146_s23  ;;  %s2003_s30 = scalar_lea.hbm %s2201_s7, 128 }
  0x2e   : > { %s2703_s27 = scalar_select %p2194_p1, 1, 0 }
  0x2f   : > { %p2004_p2 = scmp.ne.s32.totalorder %s2201_s7, %s2003_s30  ;;  %s2008_s10 = scalar_lea.hbm %s2697_s2, 256 }
  0x30   : > { %p2009_p5 = scmp.lt.s32.totalorder %s2201_s7, %s2697_s2  ;;  %p2010_p6 = scmp.lt.s32.totalorder %s2008_s10, %s2003_s30 }
  0x31   : > { %p2006_p3 = pnand %p2004_p2, %p1977_p11 }
  0x32   : > { %p2011_p10 = por %p2010_p6, %p2009_p5 }
  0x33   : > { %p2007_p4 = pneg %p2006_p3 }
  0x35   : > { %p2012_p12 = pnand %p2011_p10, %p2007_p4 }
  0x37   : > { %2015 = shalt.err (!%p2012_p12)
}
  0x38   : > { %s2016_s13 = scalar_lea.vmem %s150_s9, 128  ;;  %s2074_s23 = smov [#allocation6]  }
  0x39   : > { %p2017_p0 = scmp.ne.s32.totalorder %s150_s9, %s2016_s13  ;;  %s2021_s14 = sshll.u32 %s2074_s23, 4  ;;  %s2022_s14 = int_to_ptr.vmem [resolvable:$false] %s2021_s14 }
  0x3a   : > { %s2023_s19 = scalar_lea.vmem %s2022_s14, 256  ;;  %p2024_p2 = scmp.lt.s32.totalorder %s150_s9, %s2022_s14 }
  0x3b   : > { %p2019_p13 = pnand %p2017_p0, %p1977_p11  ;;  %p2025_p3 = scmp.lt.s32.totalorder %s2023_s19, %s2016_s13 }
  0x3d   : > { %p2020_p9 = pneg %p2019_p13  ;;  %p2026_p7 = por %p2025_p3, %p2024_p2 }
  0x3f   : > { %p2027_p1 = pnand %p2026_p7, %p2020_p9 }
  0x41   : > { %2030 = shalt.err (!%p2027_p1)
}
  0x42   : > { %1884 = dma.hbm_to_vmem [thread:$0]  (!%p2157_p8), %s2201_s7, 128, %s150_s9, %s139_s28  }
  0x43   : > { %p2704_p4 = scmp.ne.s32.totalorder %s2703_s27, 0 }
  0x44   : > { %s160_s20 = sand.u32 (!%p2704_p4), 1, %s2061_s15   ;;  %p2705_p11 = scmp.ne.s32.totalorder (!%p2704_p4), %s2700_s22, 0 }
  0x45   : > { %158 = sbr.rel (%p2704_p4) target bundleno = 685 (0x2ad), region = 28  ;;  %s1867_s24 = sshll.u32 (!%p2704_p4), %s160_s20, 7 }
  0x46   : > { %s161_s25 = scalar_lea.sflag (!%p2704_p4), [#allocation5], %s160_s20  ;;  %s2225_s26 = scalar_lea.vmem (!%p2704_p4), [#allocation4], %s1867_s24 }
  0x4a   : > { %2048 = dma.done.wait (%p2705_p11), %s161_s25, 2048  }
  0x4b   : > { %2050 = vsyncadd (%p2705_p11), %s161_s25, 4294965248  ;;  %s1868_s29 = sshll.u32 %s160_s20, 3  ;;  %s170_s4 = scalar_lea.sflag [#allocation7], %s160_s20 }
  0x4c   : > { %s2231_s6 = scalar_lea.vmem [#allocation6], %s1868_s29 }
  0x4d   : > { %2052 = dma.done.wait (%p2705_p11), %s170_s4, 128  }
  0x4e   : > { %2054 = vsyncadd (%p2705_p11), %s170_s4, 4294967168  ;;  %s203_s27 = sld [smem:[#allocation3]]  ;;  %v205_v0 = vld [vmem:[%s2225_s26 + $0x8] sm:$0xff]  ;;  %v207_v2 = vld [vmem:[%s2225_s26 + $0x18] sm:$0xff]  ;;  %s2075_s22 = smov 120   ;;  %vm928_vm0 = vcmask 1042434  }
  0x4f   : > { %v204_v3 = vld [vmem:[%s2225_s26] sm:$0xff]  ;;  %v221_v4 = vmul.f32 250.0, %v205_v0  ;;  %v223_v5 = vmul.f32 250.0, %v207_v2  ;;  %v206_v7 = vld [vmem:[%s2225_s26 + $0x10] sm:$0xff]  ;;  %v209_v9 = vld [vmem:[%s2225_s26 + $0x28] sm:$0xff]  ;;  %s2076_s7 = smov 112  }
  0x50   : > { %v220_v6 = vmul.f32 250.0, %v204_v3  ;;  %v208_v8 = vld [vmem:[%s2225_s26 + $0x20] sm:$0xff]  ;;  %v222_v10 = vmul.f32 250.0, %v206_v7  ;;  %v225_v12 = vmul.f32 250.0, %v209_v9  ;;  %v211_v13 = vld [vmem:[%s2225_s26 + $0x38] sm:$0xff]  ;;  %v210_v14 = vld [vmem:[%s2225_s26 + $0x30] sm:$0xff] }
  0x51   : > { %v224_v11 = vmul.f32 250.0, %v208_v8  ;;  %v213_v15 = vld [vmem:[%s2225_s26 + $0x48] sm:$0xff]  ;;  %v227_v19 = vmul.f32 250.0, %v211_v13  ;;  %v215_v20 = vld [vmem:[%s2225_s26 + $0x58] sm:$0xff]  ;;  %v226_v22 = vmul.f32 250.0, %v210_v14  ;;  %v212_v23 = vld [vmem:[%s2225_s26 + $0x40] sm:$0xff] }
  0x52   : > { %v229_v25 = vmul.f32 250.0, %v213_v15  ;;  %v214_v26 = vld [vmem:[%s2225_s26 + $0x50] sm:$0xff]  ;;  %v231_v28 = vmul.f32 250.0, %v215_v20  ;;  %v217_v29 = vld [vmem:[%s2225_s26 + $0x68] sm:$0xff]  ;;  %v228_v31 = vmul.f32 250.0, %v212_v23  ;;  %v219_v32 = vld [vmem:[%s2225_s26 + $0x78] sm:$0xff] }
  0x53   : > { %v230_v34 = vmul.f32 250.0, %v214_v26  ;;  %v216_v35 = vld [vmem:[%s2225_s26 + $0x60] sm:$0xff]  ;;  %v233_v37 = vmul.f32 250.0, %v217_v29  ;;  %v218_v38 = vld [vmem:[%s2225_s26 + $0x70] sm:$0xff]  ;;  %v235_v40 = vmul.f32 250.0, %v219_v32  ;;  %s2077_s8 = smov 104  }
  0x54   : > { %v236_v1 = vstv %s203_s27  ;;  %v232_v42 = vmul.f32 250.0, %v216_v35  ;;  %v234_v44 = vmul.f32 250.0, %v218_v38  ;;  %s2078_s9 = smov 96   ;;  %s2079_s28 = smov 88   ;;  %vm1139_vm1 = vcmask 8192  }
  0x55   : > { %v238_v16 = vadd.f32 %v236_v1, %v221_v4  ;;  %v240_v17 = vadd.f32 %v236_v1, %v223_v5  ;;  %v237_v18 = vadd.f32 %v236_v1, %v220_v6  ;;  %v239_v21 = vadd.f32 %v236_v1, %v222_v10  ;;  %s2080_s30 = smov 80   ;;  %s2081_s17 = smov 72  }
  0x56   : > { %v241_v24 = vadd.f32 %v236_v1, %v224_v11  ;;  %v242_v27 = vadd.f32 %v236_v1, %v225_v12  ;;  %v244_v30 = vadd.f32 %v236_v1, %v227_v19  ;;  %v243_v33 = vadd.f32 %v236_v1, %v226_v22  ;;  %p199_p7 = scmp.lt.s32.totalorder %s2124_s0, 1 }
  0x57   : > { %1927 = vtanh.f32 %v238_v16  ;;  %v246_v36 = vadd.f32 %v236_v1, %v229_v25  ;;  %v248_v39 = vadd.f32 %v236_v1, %v231_v28  ;;  %v245_v41 = vadd.f32 %v236_v1, %v228_v31 }
  0x58   : > { %1929 = vtanh.f32 %v240_v17  ;;  %v247_v43 = vadd.f32 %v236_v1, %v230_v34  ;;  %v250_v45 = vadd.f32 %v236_v1, %v233_v37  ;;  %v252_v46 = vadd.f32 %v236_v1, %v235_v40  ;;  %s2711_s0 = smov (!%p199_p7, %s2124_s0), 1 }
  0x59   : > { %1931 = vtanh.f32 %v237_v18  ;;  %v249_v47 = vadd.f32 %v236_v1, %v232_v42  ;;  %v251_v48 = vadd.f32 %v236_v1, %v234_v44  ;;  %vm927_vm2 = vcmask 1041409   ;;  %s1869_s5 = sshll.u32 %s2711_s0, 3 }
  0x5a   : > { %1933 = vtanh.f32 %v239_v21  ;;  %vm1235_vm3 = vcmask 17408   ;;  %vm930_vm4 = vcmask 1043459   ;;  %vm932_vm5 = vcmask 1044484   ;;  %s202_s12 = scalar_lea.vmem %s2698_s3, %s1869_s5 }
  0x5b   : > { %1935 = vtanh.f32 %v241_v24  ;;  %v1022_v24 = vld [vmem:[%s2231_s6] sm:$0xff]  ;;  %vm934_vm6 = vcmask 1045509   ;;  %vm936_vm7 = vcmask 1046534   ;;  %vm1327_vm8 = vcmask 31747  }
  0x5c   : > { %1937 = vtanh.f32 %v242_v27  ;;  %v2254_v25 = vmul.f32 100.0, %v1022_v24  ;;  %vm938_vm9 = vcmask 1047559   ;;  %vm1231_vm10 = vcmask 23554  }
  0x5d   : > { %1939 = vtanh.f32 %v244_v30  ;;  %vm1331_vm11 = vcmask 26624   ;;  %vm1135_vm12 = vcmask 15361   ;;  %vm1423_vm13 = vcmask 39940  }
  0x5e   : > { %1941 = vtanh.f32 %v243_v33  ;;  %v2259_v26 = vrot.slane %v2254_v25, 7  ;;  %v2264_v27 = vrot.slane %v2254_v25, 3  ;;  %v2269_v28 = vrot.slane %v2254_v25, 5 }
  0x5f   : > { %1943 = vtanh.f32 %v246_v36  ;;  %v2274_v29 = vrot.slane %v2254_v25, 6  ;;  %v2281_v30 = vrot.slane %v2254_v25, 2  ;;  %v2286_v31 = vrot.slane %v2254_v25, 4 }
  0x60   : > { %1945 = vtanh.f32 %v248_v39  ;;  %v2295_v33 = vrot.slane %v2254_v25, 1  ;;  %vm1519_vm14 = vcmask 48133   ;;  %vm1427_vm15 = vcmask 35840  }
  0x61   : > { %1947 = vtanh.f32 %v245_v41 }
  0x62   : > { %1949 = vtanh.f32 %v247_v43 }
  0x63   : > { %1951 = vtanh.f32 %v250_v45 }
  0x64   : > { %v1928_v49 = vpop.eup %1927  ;;  %1953 = vtanh.f32 %v252_v46  ;;  %v893_v46 = vlaneseq }
  0x65   : > { %v1930_v50 = vpop.eup %1929  ;;  %v270_v51 = vadd.f32 1.0, %v1928_v49  ;;  %1955 = vtanh.f32 %v249_v47 }
  0x66   : > { %v1932_v52 = vpop.eup %1931  ;;  %v272_v53 = vadd.f32 1.0, %v1930_v50  ;;  %1957 = vtanh.f32 %v251_v48  ;;  %v894_v48 = vand.u32 127, %v893_v46  ;;  %v896_v49 = vshrl.u32 %v893_v46, 7 }
  0x67   : > { %v1934_v54 = vpop.eup %1933  ;;  %315 = vmatprep.subr.mxu0 %v270_v51  ;;  %v269_v55 = vadd.f32 1.0, %v1932_v52  ;;  %349 = vmatprep.mubr.f32.mxu0 %v270_v51 }
  0x68   : > { %v1936_v56 = vpop.eup %1935  ;;  %385 = vmatprep.subr.mxu1 %v272_v53  ;;  %v271_v57 = vadd.f32 1.0, %v1934_v54  ;;  %419 = vmatprep.mubr.f32.mxu1 %v272_v53 }
  0x69   : > { %v1938_v58 = vpop.eup %1937  ;;  %316 = vmatpush1.xpose.msra.mxu0 %v269_v55  ;;  %v273_v59 = vadd.f32 1.0, %v1936_v56  ;;  %v853_v60 = vadd.f32 %v270_v51, %v269_v55 }
  0x6a   : > { %v1940_v61 = vpop.eup %1939  ;;  %386 = vmatpush1.xpose.msra.mxu1 %v271_v57  ;;  %v274_v62 = vadd.f32 1.0, %v1938_v58  ;;  %v856_v1 = vadd.f32 %v272_v53, %v271_v57  ;;  %v2385_v53 = vsub.s32 %v894_v48, %v896_v49 }
  0x6b   : > { %v1942_v63 = vpop.eup %1941  ;;  %854 = vadd.xlane.f32.xlu0 %v853_v60  ;;  %v276_v0 = vadd.f32 1.0, %v1940_v61 }
  0x6c   : > { %v1944_v2 = vpop.eup %1943  ;;  %v859_v3 = vadd.f32 %v274_v62, %v273_v59  ;;  %350 = vmatmul.mubr.f32.vlgmr.msra.gmra.mxu0 %v269_v55  ;;  %455 = vmatprep.subr.mxu0 %v274_v62  ;;  %v275_v4 = vadd.f32 1.0, %v1942_v63 }
  0x6d   : > { %v1946_v5 = vpop.eup %1945  ;;  %420 = vmatmul.mubr.f32.vlgmr.msra.gmra.mxu1 %v271_v57  ;;  %525 = vmatprep.subr.mxu1 %v276_v0  ;;  %v278_v6 = vadd.f32 1.0, %v1944_v2 }
  0x6e   : > { %v1948_v7 = vpop.eup %1947  ;;  %860 = vadd.xlane.f32.xlu1 %v859_v3  ;;  %456 = vmatpush1.xpose.msra.mxu0 %v273_v59  ;;  %v862_v8 = vadd.f32 %v276_v0, %v275_v4  ;;  %v280_v9 = vadd.f32 1.0, %v1946_v5 }
  0x6f   : > { %v1950_v10 = vpop.eup %1949  ;;  %526 = vmatpush1.xpose.msra.mxu1 %v275_v4  ;;  %857 = vadd.xlane.f32.xlu0 %v856_v1  ;;  %v277_v11 = vadd.f32 1.0, %v1948_v7 }
  0x70   : > { %v1952_v12 = vpop.eup %1951  ;;  %489 = vmatprep.mubr.f32.mxu0 %v274_v62  ;;  %559 = vmatprep.mubr.f32.mxu1 %v276_v0  ;;  %v279_v13 = vadd.f32 1.0, %v1950_v10 }
  0x71   : > { %v1954_v14 = vpop.eup %1953  ;;  %490 = vmatmul.mubr.f32.vlgmr.msra.gmra.mxu0 %v273_v59  ;;  %595 = vmatprep.subr.mxu0 %v278_v6  ;;  %v865_v15 = vadd.f32 %v278_v6, %v277_v11  ;;  %v282_v16 = vadd.f32 1.0, %v1952_v12 }
  0x72   : > { %v1956_v17 = vpop.eup %1955  ;;  %863 = vadd.xlane.f32.xlu1 %v862_v8  ;;  %560 = vmatmul.mubr.f32.vlgmr.msra.gmra.mxu1 %v275_v4  ;;  %v868_v18 = vadd.f32 %v280_v9, %v279_v13  ;;  %v284_v21 = vadd.f32 1.0, %v1954_v14 }
  0x73   : > { %v1958_v19 = vpop.eup %1957  ;;  %665 = vmatprep.subr.mxu1 %v280_v9  ;;  %596 = vmatpush1.xpose.msra.mxu0 %v277_v11  ;;  %v281_v20 = vadd.f32 1.0, %v1956_v17 }
  0x74   : > { %666 = vmatpush1.xpose.msra.mxu1 %v279_v13  ;;  %866 = vadd.xlane.f32.xlu0 %v865_v15  ;;  %v283_v22 = vadd.f32 1.0, %v1958_v19 }
  0x75   : > { %629 = vmatprep.mubr.f32.mxu0 %v278_v6  ;;  %699 = vmatprep.mubr.f32.mxu1 %v280_v9  ;;  %v871_v23 = vadd.f32 %v282_v16, %v281_v20 }
  0x76   : > { %869 = vadd.xlane.f32.xlu1 %v868_v18  ;;  %630 = vmatmul.mubr.f32.vlgmr.msra.gmra.mxu0 %v277_v11  ;;  %v874_v32 = vadd.f32 %v284_v21, %v283_v22 }
  0x77   : > { %700 = vmatmul.mubr.f32.vlgmr.msra.gmra.mxu1 %v279_v13  ;;  %735 = vmatprep.subr.mxu0 %v282_v16 }
  0x78   : > { %805 = vmatprep.subr.mxu1 %v284_v21  ;;  %736 = vmatpush1.xpose.msra.mxu0 %v281_v20 }
  0x79   : > { %806 = vmatpush1.xpose.msra.mxu1 %v283_v22  ;;  %872 = vadd.xlane.f32.xlu0 %v871_v23 }
  0x7a   : > { %769 = vmatprep.mubr.f32.mxu0 %v282_v16  ;;  %839 = vmatprep.mubr.f32.mxu1 %v284_v21 }
  0x7b   : > { %770 = vmatmul.mubr.f32.vlgmr.msra.gmra.mxu0 %v281_v20 }
  0x7c   : > { %840 = vmatmul.mubr.f32.vlgmr.msra.gmra.mxu1 %v283_v22 }
  0x87   : > { %1074 = vrot.lane.b32.xlu1 %v2254_v25, %s2075_s22 }
  0x8f   : > { %1072 = vrot.lane.b32.xlu0 %v2259_v26, %s2075_s22 }
  0x93   : > { %1080 = vrot.lane.b32.xlu0 %v2264_v27, %s2075_s22 }
  0x97   : > { %1084 = vrot.lane.b32.xlu0 %v2269_v28, %s2075_s22 }
  0x9b   : > { %1168 = vrot.lane.b32.xlu0 %v2274_v29, %s2076_s7 }
  0x9f   : > { %1172 = vrot.lane.b32.xlu0 %v2254_v25, %s2076_s7 }
  0xa3   : > { %1176 = vrot.lane.b32.xlu0 %v2281_v30, %s2076_s7 }
  0xa7   : > { %1180 = vrot.lane.b32.xlu0 %v2286_v31, %s2076_s7 }
  0xab   : > { %875 = vadd.xlane.f32.xlu1 %v874_v32  ;;  %1264 = vrot.lane.b32.xlu0 %v2269_v28, %s2077_s8 }
  0xaf   : > { %1268 = vrot.lane.b32.xlu0 %v2259_v26, %s2077_s8 }
  0xb3   : > { %1272 = vrot.lane.b32.xlu0 %v2295_v33, %s2077_s8 }
  0xb7   : > { %1276 = vrot.lane.b32.xlu0 %v2264_v27, %s2077_s8 }
  0xbb   : > { %1360 = vrot.lane.b32.xlu0 %v2286_v31, %s2078_s9 }
  0xbc   : > { %1076 = vrot.lane.b32.xlu1 %v2295_v33, %s2075_s22 }
  0xbf   : > { %1364 = vrot.lane.b32.xlu0 %v2274_v29, %s2078_s9 }
  0xc0   : > { %1078 = vrot.lane.b32.xlu1 %v2281_v30, %s2075_s22 }
  0xc3   : > { %1368 = vrot.lane.b32.xlu0 %v2254_v25, %s2078_s9 }
  0xc4   : > { %1082 = vrot.lane.b32.xlu1 %v2286_v31, %s2075_s22 }
  0xc7   : > { %1370 = vrot.lane.b32.xlu0 %v2295_v33, %s2078_s9 }
  0xc8   : > { %1086 = vrot.lane.b32.xlu1 %v2274_v29, %s2075_s22 }
  0xcb   : > { %1462 = vrot.lane.b32.xlu0 %v2274_v29, %s2079_s28 }
  0xcc   : > { %1170 = vrot.lane.b32.xlu1 %v2259_v26, %s2076_s7 }
  0xcf   : > { %1556 = vrot.lane.b32.xlu0 %v2286_v31, %s2080_s30 }
  0xd0   : > { %1174 = vrot.lane.b32.xlu1 %v2295_v33, %s2076_s7 }
  0xd3   : > { %1650 = vrot.lane.b32.xlu0 %v2281_v30, %s2081_s17 }
  0xd4   : > { %1178 = vrot.lane.b32.xlu1 %v2264_v27, %s2076_s7 }
  0xd7   : > { %1372 = vrot.lane.b32.xlu0 %v2281_v30, %s2078_s9 }
  0xd8   : > { %1182 = vrot.lane.b32.xlu1 %v2269_v28, %s2076_s7 }
  0xdb   : > { %1466 = vrot.lane.b32.xlu0 %v2254_v25, %s2079_s28 }
  0xdc   : > { %1266 = vrot.lane.b32.xlu1 %v2274_v29, %s2077_s8 }
  0xdf   : > { %1654 = vrot.lane.b32.xlu0 %v2286_v31, %s2081_s17 }
  0xe0   : > { %1270 = vrot.lane.b32.xlu1 %v2254_v25, %s2077_s8 }
  0xe3   : > { %1468 = vrot.lane.b32.xlu0 %v2295_v33, %s2079_s28 }
  0xe4   : > { %1274 = vrot.lane.b32.xlu1 %v2281_v30, %s2077_s8 }
  0xe8   : > { %1278 = vrot.lane.b32.xlu1 %v2286_v31, %s2077_s8 }
  0xec   : > { %1362 = vrot.lane.b32.xlu1 %v2269_v28, %s2078_s9 }
  0xf0   : > { %1366 = vrot.lane.b32.xlu1 %v2259_v26, %s2078_s9 }
  0xf4   : > { %v855_v34 = vpop.xlane.xlu0 %854  ;;  %1458 = vrot.lane.b32.xlu1 %v2286_v31, %s2079_s28 }
  0xf5   : > { %v877_v60 = vmul.f32 0.5, %v855_v34 }
  0xf7   : > { %v861_v44 = vpop.xlane.xlu1 %860  ;;  %v898_v6 = vrot.slane %v877_v60, %v2385_v53 }
  0xf8   : > { %v858_v35 = vpop.xlane.xlu0 %857  ;;  %1460 = vrot.lane.b32.xlu1 %v2269_v28, %s2079_s28  ;;  %v879_v55 = vmul.f32 0.5, %v861_v44 }
  0xf9   : > { %v878_v51 = vmul.f32 0.5, %v858_v35  ;;  %v990_v21 = vadd.f32 %v898_v6, %v877_v60 }
  0xfa   : > { %v906_v63 = vrot.slane %v879_v55, %v2385_v53 }
  0xfb   : > { %v864_v50 = vpop.xlane.xlu1 %863  ;;  %v902_v54 = vrot.slane %v878_v51, %v2385_v53 }
  0xfc   : > { %1464 = vrot.lane.b32.xlu1 %v2259_v26, %s2079_s28  ;;  %v880_v58 = vmul.f32 0.5, %v864_v50  ;;  %v992_v9 = vadd.f32 %v906_v63, %v879_v55 }
  0xfd   : > { %v867_v36 = vpop.xlane.xlu0 %866  ;;  %v991_v61 = vadd.f32 %v902_v54, %v878_v51 }
  0xfe   : > { %v910_v3 = vrot.slane %v880_v58, %v2385_v53  ;;  %v881_v24 = vmul.f32 0.5, %v867_v36 }
  0xff   : > { %v870_v56 = vpop.xlane.xlu1 %869 }
 0x100   : > { %1558 = vrot.lane.b32.xlu1 %v2269_v28, %s2080_s30  ;;  %v993_v13 = vadd.f32 %v910_v3, %v880_v58  ;;  %v882_v46 = vmul.f32 0.5, %v870_v56  ;;  %v914_v54 = vrot.slane %v881_v24, %v2385_v53 }
 0x102   : > { %v873_v37 = vpop.xlane.xlu0 %872  ;;  %v918_v58 = vrot.slane %v882_v46, %v2385_v53 }
 0x103   : > { %v2396_v5 = vpop.permute.xlu1 %1074  ;;  %v883_v17 = vmul.f32 0.5, %v873_v37 }
 0x104   : > { %1652 = vrot.lane.b32.xlu1 %v2264_v27, %s2081_s17 }
 0x105   : > { %v922_v48 = vrot.slane %v883_v17, %v2385_v53 }
 0x106   : > { %v2361_v38 = vpop.permute.xlu0 %1072 }
 0x108   : > { %1456 = vrot.lane.b32.xlu1 %v2264_v27, %s2079_s28 }
 0x10a   : > { %v2365_v39 = vpop.permute.xlu0 %1080 }
 0x10c   : > { %1560 = vrot.lane.b32.xlu1 %v2274_v29, %s2080_s30 }
 0x10e   : > { %v2369_v40 = vpop.permute.xlu0 %1084 }
 0x110   : > { %1374 = vrot.lane.b32.xlu1 %v2264_v27, %s2078_s9 }
 0x112   : > { %v2373_v41 = vpop.permute.xlu0 %1168 }
 0x116   : > { %v2375_v42 = vpop.permute.xlu0 %1172 }
 0x11a   : > { %v2377_v43 = vpop.permute.xlu0 %1176 }
 0x11e   : > { %v2379_v45 = vpop.permute.xlu0 %1180 }
 0x122   : > { %v2381_v47 = vpop.permute.xlu0 %1264 }
 0x126   : > { %v2383_v52 = vpop.permute.xlu0 %1268 }
 0x12a   : > { %v2388_v57 = vpop.permute.xlu0 %1272 }
 0x12c   : > { %v351_v59 = vpop.f32.mrf.mxu0 }
 0x12d   : > { %v421_v62 = vpop.f32.mrf.mxu1  ;;  %v2402_v14 = vmul.f32 0.25, %v351_v59  ;;  %v996_v59 = vadd.f32 %v922_v48, %v883_v17 }
 0x12e   : > { %v2391_v0 = vpop.permute.xlu0 %1276  ;;  %v2393_v1 = vmul.f32 0.25, %v421_v62  ;;  %v353_v2 = vpop.f32.mrf.mxu0 }
 0x12f   : > { %v423_v4 = vpop.f32.mrf.mxu1  ;;  %v998_v35 = vsub.f32 %v990_v21, %v2402_v14 }
 0x130   : > { %v999_v7 = vsub.f32 %v991_v61, %v2393_v1  ;;  %v994_v4 = vadd.f32 %v914_v54, %v881_v24 }
 0x131   : > { %v491_v8 = vpop.f32.mrf.mxu0 }
 0x132   : > { %v2400_v10 = vpop.permute.xlu0 %1360  ;;  %v847_v11 = vmul.f32 0.25, %v491_v8  ;;  %v561_v12 = vpop.f32.mrf.mxu1  ;;  %1959 = vrcp.f32 %v999_v7 }
 0x133   : > { %v848_v15 = vmul.f32 0.25, %v561_v12  ;;  %v493_v16 = vpop.f32.mrf.mxu0 }
 0x134   : > { %v876_v18 = vpop.xlane.xlu1 %875  ;;  %v1000_v19 = vsub.f32 %v992_v9, %v847_v11  ;;  %v563_v20 = vpop.f32.mrf.mxu1 }
 0x135   : > { %v884_v22 = vmul.f32 0.5, %v876_v18  ;;  %v1001_v23 = vsub.f32 %v993_v13, %v848_v15  ;;  %v995_v13 = vadd.f32 %v918_v58, %v882_v46 }
 0x136   : > { %1961 = vrcp.f32 %v1000_v19  ;;  %v2404_v32 = vpop.permute.xlu0 %1364  ;;  %v631_v34 = vpop.f32.mrf.mxu0 }
 0x137   : > { %1963 = vrcp.f32 %v1001_v23  ;;  %v701_v44 = vpop.f32.mrf.mxu1  ;;  %v926_v50 = vrot.slane %v884_v22, %v2385_v53  ;;  %v849_v60 = vmul.f32 0.25, %v631_v34 }
 0x138   : > { %v2408_v37 = vpop.permute.xlu1 %1076  ;;  %v633_v49 = vpop.f32.mrf.mxu0  ;;  %1965 = vrcp.f32 %v998_v35  ;;  %v850_v6 = vmul.f32 0.25, %v701_v44 }
 0x139   : > { %v703_v51 = vpop.f32.mrf.mxu1  ;;  %v997_v63 = vadd.f32 %v926_v50, %v884_v22  ;;  %v1002_v16 = vsub.f32 %v994_v4, %v849_v60 }
 0x13a   : > { %v2412_v36 = vpop.permute.xlu0 %1368  ;;  %v1003_v18 = vsub.f32 %v995_v13, %v850_v6 }
 0x13b   : > { %v771_v55 = vpop.f32.mrf.mxu0 }
 0x13c   : > { %v2415_v61 = vpop.permute.xlu1 %1078  ;;  %v851_v56 = vmul.f32 0.25, %v771_v55  ;;  %v841_v62 = vpop.f32.mrf.mxu1 }
 0x13d   : > { %v852_v2 = vmul.f32 0.25, %v841_v62  ;;  %v773_v3 = vpop.f32.mrf.mxu0 }
 0x13e   : > { %v1004_v7 = vsub.f32 %v996_v59, %v851_v56  ;;  %v2417_v8 = vpop.permute.xlu0 %1370  ;;  %v843_v9 = vpop.f32.mrf.mxu1 }
 0x13f   : > { %v1005_v12 = vsub.f32 %v997_v63, %v852_v2  ;;  %v1960_v17 = vpop.eup %1959 }
 0x140   : > { %1967 = vrcp.f32 %v1004_v7  ;;  %v2419_v53 = vpop.permute.xlu1 %1082  ;;  %v2430_v35 = vmul.f32 %v1960_v17, %v2393_v1 }
 0x141   : > { %1969 = vrcp.f32 %v1005_v12 }
 0x142   : > { %v2421_v19 = vpop.permute.xlu0 %1462  ;;  %1971 = vrcp.f32 %v1002_v16 }
 0x143   : > { %v1962_v20 = vpop.eup %1961  ;;  %1973 = vrcp.f32 %v1003_v18 }
 0x144   : > { %v1964_v21 = vpop.eup %1963  ;;  %v2423_v22 = vmul.f32 %v1962_v20, %v847_v11  ;;  %v1087_v23 = vpop.permute.xlu1 %1086 }
 0x145   : > { %v2425_v24 = vmul.f32 %v1964_v21, %v848_v15  ;;  %v1966_v48 = vpop.eup %1965  ;;  %v1097_v15 = vsub.f32 %v2430_v35, %v2396_v5 }
 0x146   : > { %v2427_v34 = vpop.permute.xlu0 %1556  ;;  %v2437_v11 = vmul.f32 %v1966_v48, %v2402_v14  ;;  %v1194_v21 = vsub.f32 %v2423_v22, %v2375_v42  ;;  %v1290_v48 = vsub.f32 %v2423_v22, %v2383_v52 }
 0x147   : > { %v1483_v44 = vsub.f32 %v2425_v24, %v2421_v19  ;;  %v1578_v46 = vsub.f32 %v2423_v22, %v2427_v34  ;;  %v1105_v58 = vand.u32 2147483647, %v1097_v15  ;;  %v1099_v12 = vsub.f32 %v2425_v24, %v2415_v61 }
 0x148   : > { %v1171_v49 = vpop.permute.xlu1 %1170  ;;  %v1096_v1 = vsub.f32 %v2437_v11, %v2361_v38  ;;  %v1192_v62 = vsub.f32 %v2437_v11, %v2373_v41  ;;  %v1288_v14 = vsub.f32 %v2437_v11, %v2381_v47  ;;  %v1098_v41 = vsub.f32 %v2423_v22, %v2408_v37 }
 0x149   : > { %v1120_v7 = vrot.slane %v1105_v58, 7 }
 0x14a   : > { %v1104_v4 = vand.u32 2147483647, %v1096_v1  ;;  %v1200_v13 = vand.u32 2147483647, %v1192_v62  ;;  %v1296_v17 = vand.u32 2147483647, %v1288_v14 }
 0x14b   : > { %v1106_v61 = vand.u32 2147483647, %v1098_v41  ;;  %v1202_v14 = vand.u32 2147483647, %v1194_v21 }
 0x14c   : > { %v1175_v50 = vpop.permute.xlu1 %1174 }
 0x14d   : > { %v1968_v51 = vpop.eup %1967 }
 0x14e   : > { %v1970_v54 = vpop.eup %1969  ;;  %v2441_v55 = vmul.f32 %v1968_v51, %v851_v56  ;;  %v1193_v56 = vsub.f32 %v2430_v35, %v1171_v49  ;;  %v1121_v49 = vsel %vm928_vm0, %v1120_v7, %v1104_v4 }
 0x14f   : > { %v2445_v59 = vmul.f32 %v1970_v54, %v852_v2  ;;  %v1972_v3 = vpop.eup %1971  ;;  %v1107_v54 = vand.u32 2147483647, %v1099_v12 }
 0x150   : > { %v1179_v63 = vpop.permute.xlu1 %1178  ;;  %v1198_v38 = vsub.f32 %v2441_v55, %v2379_v45  ;;  %v1974_v2 = vpop.eup %1973  ;;  %v2457_v9 = vmul.f32 %v1972_v3, %v849_v60  ;;  %v1201_v37 = vand.u32 2147483647, %v1193_v56  ;;  %v1195_v60 = vsub.f32 %v2425_v24, %v1175_v50 }
 0x151   : > { %v1103_v5 = vsub.f32 %v2445_v59, %v1087_v23  ;;  %v2464_v23 = vmul.f32 %v1974_v2, %v850_v6  ;;  %v1298_v56 = vand.u32 2147483647, %v1290_v48  ;;  %v1124_v41 = vrot.slane %v1107_v54, 5 }
 0x152   : > { %v1206_v20 = vand.u32 2147483647, %v1198_v38  ;;  %v1292_v6 = vsub.f32 %v2457_v9, %v2388_v57  ;;  %v1196_v50 = vsub.f32 %v2457_v9, %v2377_v43  ;;  %v1216_v3 = vrot.slane %v1201_v37, 7 }
 0x153   : > { %v1111_v47 = vand.u32 2147483647, %v1103_v5  ;;  %v1197_v1 = vsub.f32 %v2464_v23, %v1179_v63  ;;  %v1203_v5 = vand.u32 2147483647, %v1195_v60  ;;  %v1100_v63 = vsub.f32 %v2457_v9, %v2365_v39 }
 0x154   : > { %v1183_v16 = vpop.permute.xlu1 %1182  ;;  %v1226_v62 = vrot.slane %v1206_v20, 2  ;;  %v1122_v38 = vrot.slane %v1106_v61, 6  ;;  %v1101_v57 = vsub.f32 %v2464_v23, %v2419_v53  ;;  %v1300_v12 = vand.u32 2147483647, %v1292_v6 }
 0x155   : > { %v1132_v18 = vrot.slane %v1111_v47, 1  ;;  %v1199_v45 = vsub.f32 %v2445_v59, %v1183_v16  ;;  %v1205_v4 = vand.u32 2147483647, %v1197_v1  ;;  %v1218_v20 = vrot.slane %v1202_v14, 6 }
 0x156   : > { %v1217_v39 = vsel %vm930_vm4, %v1216_v3, %v1200_v13  ;;  %v1220_v21 = vrot.slane %v1203_v5, 5  ;;  %v1102_v53 = vsub.f32 %v2441_v55, %v2369_v40  ;;  %v1108_v37 = vand.u32 2147483647, %v1100_v63 }
 0x157   : > { %v1207_v15 = vand.u32 2147483647, %v1199_v45  ;;  %v1140_v51 = vsel %vm1139_vm1, %v1132_v18, 0.0  ;;  %v1204_v45 = vand.u32 2147483647, %v1196_v50  ;;  %v1123_v60 = vsel %vm930_vm4, %v1122_v38, %v1121_v49 }
 0x158   : > { %v1267_v42 = vpop.permute.xlu1 %1266  ;;  %1141 = vadd.xlane.f32.xlu1 %v1140_v51  ;;  %v1109_v48 = vand.u32 2147483647, %v1101_v57  ;;  %v1224_v51 = vrot.slane %v1205_v4, 3  ;;  %v1314_v1 = vrot.slane %v1298_v56, 6  ;;  %v1294_v6 = vsub.f32 %v2441_v55, %v2391_v0 }
 0x159   : > { %v1227_v58 = vrot.slane %v1207_v15, 1  ;;  %v1289_v52 = vsub.f32 %v2430_v35, %v1267_v42  ;;  %v1318_v42 = vrot.slane %v1300_v12, 4  ;;  %v1222_v40 = vrot.slane %v1204_v45, 4 }
 0x15a   : > { %v1125_v5 = vsel %vm932_vm5, %v1124_v41, %v1123_v60  ;;  %v1302_v63 = vand.u32 2147483647, %v1294_v6  ;;  %v1128_v38 = vrot.slane %v1109_v48, 3  ;;  %vm1615_vm1 = vcmask 56326  }
 0x15b   : > { %v1297_v2 = vand.u32 2147483647, %v1289_v52  ;;  %v1228_v43 = vsel %vm927_vm2, %v1227_v58, %v1226_v62  ;;  %v1219_v58 = vsel %vm932_vm5, %v1218_v20, %v1217_v39  ;;  %v1110_v62 = vand.u32 2147483647, %v1102_v53  ;;  %v1651_v39 = vpop.permute.xlu0 %1650 }
 0x15c   : > { %v1271_v7 = vpop.permute.xlu1 %1270  ;;  %v1236_v47 = vsel %vm1235_vm3, %v1228_v43, 0.0  ;;  %v1221_v49 = vsel %vm934_vm6, %v1220_v21, %v1219_v58  ;;  %v1321_v20 = vrot.slane %v1302_v63, 2  ;;  %vm1619_vm3 = vcmask 54272  }
 0x15d   : > { %v1312_v16 = vrot.slane %v1297_v2, 7  ;;  %v1291_v18 = vsub.f32 %v2425_v24, %v1271_v7  ;;  %1237 = vadd.xlane.f32.xlu1 %v1236_v47  ;;  %v1223_v43 = vsel %vm936_vm7, %v1222_v40, %v1221_v49  ;;  %v1130_v12 = vrot.slane %v1110_v62, 2 }
 0x15e   : > { %v1225_v7 = vsel %vm938_vm9, %v1224_v51, %v1223_v43 }
 0x15f   : > { %v1313_v61 = vsel %vm932_vm5, %v1312_v16, %v1296_v17  ;;  %v1299_v15 = vand.u32 2147483647, %v1291_v18  ;;  %v1126_v17 = vrot.slane %v1108_v37, 4  ;;  %v1384_v16 = vsub.f32 %v2437_v11, %v2400_v10 }
 0x160   : > { %v1275_v54 = vpop.permute.xlu1 %1274  ;;  %v1315_v52 = vsel %vm934_vm6, %v1314_v1, %v1313_v61  ;;  %v1386_v18 = vsub.f32 %v2423_v22, %v2404_v32  ;;  %v1232_v37 = vsel %vm1231_vm10, %v1225_v7, 0.0  ;;  %v1673_v7 = vsub.f32 %v2430_v35, %v1651_v39 }
 0x161   : > { %v1316_v50 = vrot.slane %v1299_v15, 5  ;;  %v1293_v13 = vsub.f32 %v2464_v23, %v1275_v54  ;;  %v1127_v47 = vsel %vm934_vm6, %v1126_v17, %v1125_v5  ;;  %v1392_v1 = vand.u32 2147483647, %v1384_v16 }
 0x162   : > { %v1129_v60 = vsel %vm936_vm7, %v1128_v38, %v1127_v47  ;;  %v1394_v15 = vand.u32 2147483647, %v1386_v18  ;;  %v1681_v34 = vand.u32 2147483647, %v1673_v7  ;;  %vm1711_vm10 = vcmask 64519  }
 0x163   : > { %v1301_v14 = vand.u32 2147483647, %v1293_v13  ;;  %v1317_v3 = vsel %vm936_vm7, %v1316_v50, %v1315_v52  ;;  %v1131_v61 = vsel %vm938_vm9, %v1130_v12, %v1129_v60  ;;  %v2514_v13 = vpop.permute.xlu0 %1372 }
 0x164   : > { %v1279_v56 = vpop.permute.xlu1 %1278  ;;  %v1319_v0 = vsel %vm938_vm9, %v1318_v42, %v1317_v3  ;;  %v1136_v50 = vsel %vm1135_vm12, %v1131_v61, 0.0  ;;  %v1410_v52 = vrot.slane %v1394_v15, 6  ;;  %vm1767_vm12 = vcmask 7168  }
 0x165   : > { %v1295_v57 = vsub.f32 %v2445_v59, %v1279_v56  ;;  %v1328_v2 = vsel %vm1327_vm8, %v1319_v0, 0.0  ;;  %v1320_v4 = vrot.slane %v1301_v14, 3  ;;  %v1491_v0 = vand.u32 2147483647, %v1483_v44 }
 0x166   : > { %1329 = vadd.xlane.f32.xlu0 %v1328_v2  ;;  %v1586_v2 = vand.u32 2147483647, %v1578_v46  ;;  %vm1523_vm8 = vcmask 45056  }
 0x167   : > { %v1303_v41 = vand.u32 2147483647, %v1295_v57  ;;  %v1322_v48 = vsel %vm927_vm2, %v1321_v20, %v1320_v4  ;;  %v2521_v5 = vpop.permute.xlu0 %1466  ;;  %v1508_v4 = vrot.slane %v1491_v0, 5 }
 0x168   : > { %v1363_v45 = vpop.permute.xlu1 %1362  ;;  %v1602_v18 = vrot.slane %v1586_v2, 6 }
 0x169   : > { %v1323_v21 = vrot.slane %v1303_v41, 1  ;;  %v1385_v53 = vsub.f32 %v2430_v35, %v1363_v45 }
 0x16a   : > { %1233 = vadd.xlane.f32.xlu0 %v1232_v37  ;;  %v1696_v37 = vrot.slane %v1681_v34, 7 }
 0x16b   : > { %v1393_v10 = vand.u32 2147483647, %v1385_v53  ;;  %v1324_v32 = vsel %vm928_vm0, %v1323_v21, %v1322_v48  ;;  %v1655_v38 = vpop.permute.xlu0 %1654 }
 0x16c   : > { %v1367_v51 = vpop.permute.xlu1 %1366  ;;  %v1332_v54 = vsel %vm1331_vm11, %v1324_v32, 0.0  ;;  %v1675_v41 = vsub.f32 %v2425_v24, %v1655_v38  ;;  %vm1715_vm11 = vcmask 63488  }
 0x16d   : > { %v1408_v42 = vrot.slane %v1393_v10, 7  ;;  %v1387_v6 = vsub.f32 %v2425_v24, %v1367_v51  ;;  %1333 = vadd.xlane.f32.xlu1 %v1332_v54 }
 0x16e   : > { %1137 = vadd.xlane.f32.xlu0 %v1136_v50  ;;  %v1683_v20 = vand.u32 2147483647, %v1675_v41  ;;  %v1389_v50 = vsub.f32 %v2464_v23, %v2417_v8 }
 0x16f   : > { %v1395_v58 = vand.u32 2147483647, %v1387_v6  ;;  %v1409_v40 = vsel %vm934_vm6, %v1408_v42, %v1392_v1  ;;  %v1388_v6 = vsub.f32 %v2457_v9, %v2412_v36 }
 0x170   : > { %v1459_v49 = vpop.permute.xlu1 %1458  ;;  %v1411_v17 = vsel %vm936_vm7, %v1410_v52, %v1409_v40  ;;  %v1699_v48 = vrot.slane %v1683_v20, 5  ;;  %v1390_v40 = vsub.f32 %v2441_v55, %v2514_v13  ;;  %v1397_v0 = vand.u32 2147483647, %v1389_v50 }
 0x171   : > { %v1412_v62 = vrot.slane %v1395_v58, 5  ;;  %v1481_v58 = vsub.f32 %v2430_v35, %v1459_v49 }
 0x172   : > { %v1398_v38 = vand.u32 2147483647, %v1390_v40  ;;  %v1415_v8 = vrot.slane %v1397_v0, 3 }
 0x173   : > { %v2519_v14 = vsel %vm938_vm9, %v1412_v62, %v1411_v17 }
 0x174   : > { %v1461_v3 = vpop.permute.xlu1 %1460  ;;  %v1417_v49 = vrot.slane %v1398_v38, 2 }
 0x175   : > { %v1482_v17 = vsub.f32 %v2423_v22, %v1461_v3  ;;  %v1424_v3 = vsel %vm1423_vm13, %v2519_v14, 0.0 }
 0x177   : > { %v1490_v2 = vand.u32 2147483647, %v1482_v17 }
 0x178   : > { %v1465_v56 = vpop.permute.xlu1 %1464 }
 0x179   : > { %v1484_v63 = vsub.f32 %v2457_v9, %v1465_v56  ;;  %v1396_v56 = vand.u32 2147483647, %v1388_v6 }
 0x17b   : > { %v1492_v57 = vand.u32 2147483647, %v1484_v63  ;;  %v1489_v63 = vand.u32 2147483647, %v1481_v58 }
 0x17c   : > { %v1559_v43 = vpop.permute.xlu1 %1558 }
 0x17d   : > { %v1509_v47 = vrot.slane %v1492_v57, 4  ;;  %v1579_v12 = vsub.f32 %v2425_v24, %v1559_v43  ;;  %v1414_v43 = vrot.slane %v1396_v56, 4 }
 0x17e   : > { %1554 = vrot.lane.b32.xlu1 %v2264_v27, %s2080_s30 }
 0x17f   : > { %v2536_v19 = vsel %vm927_vm2, %v1509_v47, %v1508_v4  ;;  %v1587_v44 = vand.u32 2147483647, %v1579_v12  ;;  %v1504_v4 = vrot.slane %v1489_v63, 7  ;;  %v1506_v47 = vrot.slane %v1490_v2, 6 }
 0x180   : > { %v1653_v16 = vpop.permute.xlu1 %1652  ;;  %v1416_v12 = vsel %vm927_vm2, %v1415_v8, %v1414_v43 }
 0x181   : > { %v1603_v46 = vrot.slane %v1587_v44, 5  ;;  %v1674_v45 = vsub.f32 %v2423_v22, %v1653_v16  ;;  %v1418_v44 = vsel %vm928_vm0, %v1417_v49, %v1416_v12 }
 0x182   : > { %1656 = vrot.lane.b32.xlu1 %v2269_v28, %s2081_s17 }
 0x183   : > { %v1604_v39 = vsel %vm927_vm2, %v1603_v46, %v1602_v18  ;;  %v1682_v21 = vand.u32 2147483647, %v1674_v45  ;;  %v1047_v45 = vsub.f32 %v2445_v59, %v2259_v26 }
 0x184   : > { %v1457_v53 = vpop.permute.xlu1 %1456  ;;  %1562 = vrot.lane.b32.xlu0 %v2259_v26, %s2080_s30 }
 0x185   : > { %v1697_v60 = vrot.slane %v1682_v21, 6  ;;  %v1480_v52 = vsub.f32 %v2437_v11, %v1457_v53  ;;  %v1055_v20 = vand.u32 2147483647, %v1047_v45 }
 0x186   : > { %1564 = vrot.lane.b32.xlu1 %v2254_v25, %s2080_s30 }
 0x187   : > { %v1698_v61 = vsel %vm927_vm2, %v1697_v60, %v1696_v37  ;;  %v1488_v57 = vand.u32 2147483647, %v1480_v52  ;;  %v2589_v37 = vpop.permute.xlu0 %1468 }
 0x188   : > { %v1561_v10 = vpop.permute.xlu1 %1560  ;;  %1470 = vrot.lane.b32.xlu0 %v2281_v30, %s2079_s28  ;;  %v2550_v32 = vsel %vm928_vm0, %v1699_v48, %v1698_v61  ;;  %v1040_v48 = vsub.f32 %v2437_v11, %v2254_v25  ;;  %v1043_v61 = vsub.f32 %v2425_v24, %v2264_v27 }
 0x189   : > { %v1580_v15 = vsub.f32 %v2457_v9, %v1561_v10  ;;  %v1505_v13 = vsel %vm936_vm7, %v1504_v4, %v1488_v57  ;;  %v1042_v10 = vsub.f32 %v2423_v22, %v2281_v30 }
 0x18a   : > { %1552 = vrot.lane.b32.xlu1 %v2281_v30, %s2080_s30  ;;  %v1507_v41 = vsel %vm938_vm9, %v1506_v47, %v1505_v13  ;;  %v1051_v6 = vand.u32 2147483647, %v1043_v61 }
 0x18b   : > { %v1588_v51 = vand.u32 2147483647, %v1580_v15  ;;  %v1520_v18 = vsel %vm1519_vm14, %v1507_v41, 0.0  ;;  %v1044_v15 = vsub.f32 %v2457_v9, %v2286_v31  ;;  %v1050_v27 = vand.u32 2147483647, %v1042_v10 }
 0x18c   : > { %1658 = vrot.lane.b32.xlu0 %v2274_v29, %s2081_s17  ;;  %v1375_v42 = vpop.permute.xlu1 %1374 }
 0x18d   : > { %v1605_v54 = vrot.slane %v1588_v51, 4  ;;  %v1391_v62 = vsub.f32 %v2445_v59, %v1375_v42  ;;  %v1045_v51 = vsub.f32 %v2464_v23, %v2269_v28  ;;  %v1052_v24 = vand.u32 2147483647, %v1044_v15 }
 0x18e   : > { %1660 = vrot.lane.b32.xlu1 %v2259_v26, %s2081_s17  ;;  %v1041_v26 = vsub.f32 %v2430_v35, %v2295_v33 }
 0x18f   : > { %v2560_v1 = vsel %vm928_vm0, %v1605_v54, %v1604_v39  ;;  %v1399_v36 = vand.u32 2147483647, %v1391_v62  ;;  %v1046_v54 = vsub.f32 %v2441_v55, %v2274_v29  ;;  %v1053_v58 = vand.u32 2147483647, %v1045_v51 }
 0x190   : > { %1566 = vrot.lane.b32.xlu0 %v2295_v33, %s2080_s30  ;;  %v1049_v50 = vand.u32 2147483647, %v1041_v26 }
 0x191   : > { %v1419_v7 = vrot.slane %v1399_v36, 1  ;;  %v1054_v30 = vand.u32 2147483647, %v1046_v54 }
 0x192   : > { %1648 = vrot.lane.b32.xlu1 %v2295_v33, %s2081_s17  ;;  %v1485_v33 = vsub.f32 %v2464_v23, %v2521_v5 }
 0x193   : > { %v1420_v16 = vsel %vm930_vm4, %v1419_v7, %v1418_v44 }
 0x194   : > { %1662 = vrot.lane.b32.xlu0 %v2254_v25, %s2081_s17  ;;  %v1428_v34 = vsel %vm1427_vm15, %v1420_v16, 0.0  ;;  %v1048_v25 = vand.u32 2147483647, %v1040_v48  ;;  %v1493_v51 = vand.u32 2147483647, %v1485_v33 }
 0x1b3   : > { %1425 = vadd.xlane.f32.xlu0 %v1424_v3 }
 0x1b6   : > { %1521 = vadd.xlane.f32.xlu1 %v1520_v18 }
 0x1b7   : > { %1429 = vadd.xlane.f32.xlu0 %v1428_v34 }
 0x1e1   : > { %v1142_v46 = vpop.xlane.xlu1 %1141 }
 0x1e2   : > { %v1167_v14 = vadd.f32 %v1142_v46, %v1055_v20 }
 0x1e6   : > { %v2586_v39 = vpop.xlane.xlu1 %1237 }
 0x1e7   : > { %v1247_v21 = vrot.slane %v2586_v39, 1 }
 0x1e9   : > { %v1263_v53 = vadd.f32 %v1247_v21, %v1167_v14 }
 0x1ef   : > { %v2591_v60 = vpop.xlane.xlu0 %1329 }
 0x1f0   : > { %v1337_v22 = vrot.slane %v2591_v60, 3  ;;  %v1338_v31 = vrot.slane %v2591_v60, 4  ;;  %v1340_v28 = vrot.slane %v2591_v60, 6  ;;  %v1339_v20 = vrot.slane %v2591_v60, 5 }
 0x1f1   : > { %v1341_v48 = vrot.slane %v2591_v60, 7 }
 0x1f3   : > { %v1234_v42 = vpop.xlane.xlu0 %1233 }
 0x1f4   : > { %v1241_v40 = vrot.slane %v1234_v42, 2  ;;  %v1242_v29 = vrot.slane %v1234_v42, 3  ;;  %v1243_v62 = vrot.slane %v1234_v42, 4  ;;  %v1244_v17 = vrot.slane %v1234_v42, 5 }
 0x1f5   : > { %v1246_v4 = vrot.slane %v1234_v42, 7  ;;  %v1245_v16 = vrot.slane %v1234_v42, 6 }
 0x1f6   : > { %v1334_v52 = vpop.xlane.xlu1 %1333 }
 0x1f7   : > { %v1343_v56 = vrot.slane %v1334_v52, 2  ;;  %v1138_v0 = vpop.xlane.xlu0 %1137 }
 0x1f8   : > { %v1148_v63 = vrot.slane %v1138_v0, 4  ;;  %v1150_v38 = vrot.slane %v1138_v0, 6  ;;  %v1151_v57 = vrot.slane %v1138_v0, 7  ;;  %v1145_v5 = vrot.slane %v1138_v0, 1 }
 0x1f9   : > { %v2612_v36 = vadd.f32 %v1343_v56, %v1263_v53  ;;  %v1146_v2 = vrot.slane %v1138_v0, 2  ;;  %v1147_v43 = vrot.slane %v1138_v0, 3  ;;  %v1149_v8 = vrot.slane %v1138_v0, 5 }
 0x1fa   : > { %v1555_v49 = vpop.permute.xlu1 %1554  ;;  %v1163_v7 = vadd.f32 %v1148_v63, %v1051_v6  ;;  %v1160_v13 = vadd.f32 %v1145_v5, %v1048_v25  ;;  %v1165_v47 = vadd.f32 %v1150_v38, %v1053_v58  ;;  %v1166_v45 = vadd.f32 %v1151_v57, %v1054_v30 }
 0x1fb   : > { %v1563_v12 = vpop.permute.xlu0 %1562  ;;  %v1161_v3 = vadd.f32 %v1146_v2, %v1049_v50  ;;  %v1162_v41 = vadd.f32 %v1147_v43, %v1050_v27  ;;  %v1164_v44 = vadd.f32 %v1149_v8, %v1052_v24  ;;  %v1486_v50 = vsub.f32 %v2441_v55, %v2589_v37 }
 0x1fc   : > { %v1259_v18 = vadd.f32 %v1244_v17, %v1163_v7  ;;  %v1256_v34 = vadd.f32 %v1241_v40, %v1160_v13  ;;  %v1261_v46 = vadd.f32 %v1246_v4, %v1165_v47  ;;  %v1581_v54 = vsub.f32 %v2464_v23, %v1563_v12 }
 0x1fd   : > { %v1257_v14 = vadd.f32 %v1242_v29, %v1161_v3  ;;  %v1258_v21 = vadd.f32 %v1243_v62, %v1162_v41  ;;  %v1260_v53 = vadd.f32 %v1245_v16, %v1164_v44  ;;  %v1342_v27 = vrot.slane %v1334_v52, 1 }
 0x1fe   : > { %v1657_v61 = vpop.permute.xlu1 %1656  ;;  %v2616_v26 = vadd.f32 %v1340_v28, %v1259_v18  ;;  %v2618_v10 = vadd.f32 %v1337_v22, %v1256_v34  ;;  %v2620_v15 = vadd.f32 %v1334_v52, %v1261_v46  ;;  %v1262_v24 = vadd.f32 %v2586_v39, %v1166_v45 }
 0x1ff   : > { %v1471_v42 = vpop.permute.xlu0 %1470  ;;  %v2623_v25 = vadd.f32 %v1338_v31, %v1257_v14  ;;  %v2625_v6 = vadd.f32 %v1339_v20, %v1258_v21  ;;  %v2629_v60 = vadd.f32 %v1341_v48, %v1260_v53  ;;  %v1577_v58 = vsub.f32 %v2430_v35, %v1555_v49 }
 0x200   : > { %v1487_v30 = vsub.f32 %v2445_v59, %v1471_v42  ;;  %v2634_v22 = vadd.f32 %v1342_v27, %v1262_v24  ;;  %v1589_v28 = vand.u32 2147483647, %v1581_v54  ;;  %v1676_v31 = vsub.f32 %v2457_v9, %v1657_v61 }
 0x201   : > { %v1511_v62 = vrot.slane %v1493_v51, 3  ;;  %v1494_v37 = vand.u32 2147483647, %v1486_v50  ;;  %v1585_v17 = vand.u32 2147483647, %v1577_v58 }
 0x202   : > { %v1565_v33 = vpop.permute.xlu1 %1564  ;;  %v1495_v56 = vand.u32 2147483647, %v1487_v30  ;;  %v1607_v35 = vrot.slane %v1589_v28, 3  ;;  %v1684_v63 = vand.u32 2147483647, %v1676_v31 }
 0x203   : > { %v1582_v40 = vsub.f32 %v2441_v55, %v1565_v33  ;;  %v1659_v29 = vpop.permute.xlu0 %1658  ;;  %v1512_v5 = vsel %vm928_vm0, %v1511_v62, %v2536_v19  ;;  %v1513_v9 = vrot.slane %v1494_v37, 2  ;;  %v1600_v8 = vrot.slane %v1585_v17, 7 }
 0x204   : > { %v1677_v52 = vsub.f32 %v2464_v23, %v1659_v29  ;;  %v1515_v4 = vrot.slane %v1495_v56, 1  ;;  %v1701_v12 = vrot.slane %v1684_v63, 4  ;;  %v1608_v44 = vsel %vm930_vm4, %v1607_v35, %v2560_v1 }
 0x205   : > { %v1590_v39 = vand.u32 2147483647, %v1582_v40  ;;  %v1514_v47 = vsel %vm930_vm4, %v1513_v9, %v1512_v5 }
 0x206   : > { %v1553_v0 = vpop.permute.xlu1 %1552  ;;  %v1685_v2 = vand.u32 2147483647, %v1677_v52  ;;  %v1516_v14 = vsel %vm932_vm5, %v1515_v4, %v1514_v47  ;;  %v1702_v1 = vsel %vm930_vm4, %v1701_v12, %v2550_v32 }
 0x207   : > { %v1576_v38 = vsub.f32 %v2437_v11, %v1553_v0  ;;  %v1567_v57 = vpop.permute.xlu0 %1566  ;;  %v1609_v23 = vrot.slane %v1590_v39, 2  ;;  %v1524_v54 = vsel %vm1523_vm8, %v1516_v14, 0.0 }
 0x208   : > { %v1583_v43 = vsub.f32 %v2445_v59, %v1567_v57  ;;  %v1703_v16 = vrot.slane %v1685_v2, 3 }
 0x209   : > { %v1584_v49 = vand.u32 2147483647, %v1576_v38  ;;  %v1610_v20 = vsel %vm932_vm5, %v1609_v23, %v1608_v44 }
 0x20a   : > { %v1591_v7 = vand.u32 2147483647, %v1583_v43  ;;  %v1661_v13 = vpop.permute.xlu1 %1660  ;;  %v1704_v42 = vsel %vm932_vm5, %v1703_v16, %v1702_v1 }
 0x20b   : > { %v1678_v3 = vsub.f32 %v2441_v55, %v1661_v13  ;;  %v1663_v41 = vpop.permute.xlu0 %1662  ;;  %v1601_v19 = vsel %vm938_vm9, %v1600_v8, %v1584_v49 }
 0x20c   : > { %v1611_v18 = vrot.slane %v1591_v7, 1  ;;  %v1679_v34 = vsub.f32 %v2445_v59, %v1663_v41  ;;  %v1616_v46 = vsel %vm1615_vm1, %v1601_v19, 0.0 }
 0x20d   : > { %v1686_v45 = vand.u32 2147483647, %v1678_v3  ;;  %1617 = vadd.xlane.f32.xlu0 %v1616_v46 }
 0x20e   : > { %v1687_v55 = vand.u32 2147483647, %v1679_v34  ;;  %v1649_v21 = vpop.permute.xlu1 %1648  ;;  %v1612_v53 = vsel %vm934_vm6, %v1611_v18, %v1610_v20 }
 0x20f   : > { %v1705_v48 = vrot.slane %v1686_v45, 2  ;;  %v1672_v59 = vsub.f32 %v2437_v11, %v1649_v21  ;;  %v1620_v61 = vsel %vm1619_vm3, %v1612_v53, 0.0 }
 0x210   : > { %v1707_v51 = vrot.slane %v1687_v55, 1  ;;  %1621 = vadd.xlane.f32.xlu1 %v1620_v61 }
 0x211   : > { %v1680_v50 = vand.u32 2147483647, %v1672_v59  ;;  %1525 = vadd.xlane.f32.xlu0 %v1524_v54  ;;  %v1706_v27 = vsel %vm934_vm6, %v1705_v48, %v1704_v42 }
 0x212   : > { %v1708_v24 = vsel %vm936_vm7, %v1707_v51, %v1706_v27 }
 0x213   : > { %v1712_v58 = vsel %vm1711_vm10, %v1680_v50, 0.0  ;;  %v1716_v30 = vsel %vm1715_vm11, %v1708_v24, 0.0 }
 0x214   : > { %1713 = vadd.xlane.f32.xlu1 %v1712_v58 }
 0x215   : > { %1717 = vadd.xlane.f32.xlu0 %v1716_v30 }
 0x23c   : > { %v1426_v32 = vpop.xlane.xlu0 %1425 }
 0x23d   : > { %v1433_v11 = vrot.slane %v1426_v32, 4  ;;  %v1434_v33 = vrot.slane %v1426_v32, 5  ;;  %v1435_v28 = vrot.slane %v1426_v32, 6  ;;  %v1436_v29 = vrot.slane %v1426_v32, 7 }
 0x23f   : > { %v1522_v31 = vpop.xlane.xlu1 %1521  ;;  %v1448_v62 = vadd.f32 %v1433_v11, %v2618_v10  ;;  %v1449_v37 = vadd.f32 %v1434_v33, %v2623_v25  ;;  %v1450_v56 = vadd.f32 %v1435_v28, %v2625_v6  ;;  %v1451_v9 = vadd.f32 %v1436_v29, %v2616_v26 }
 0x240   : > { %v1430_v40 = vpop.xlane.xlu0 %1429  ;;  %v1529_v52 = vrot.slane %v1522_v31, 5  ;;  %v1530_v17 = vrot.slane %v1522_v31, 6  ;;  %v1531_v39 = vrot.slane %v1522_v31, 7 }
 0x241   : > { %v1437_v0 = vrot.slane %v1430_v40, 1  ;;  %v1438_v35 = vrot.slane %v1430_v40, 2  ;;  %v1439_v63 = vrot.slane %v1430_v40, 3  ;;  %v1452_v10 = vadd.f32 %v1430_v40, %v2629_v60 }
 0x242   : > { %v1544_v2 = vadd.f32 %v1529_v52, %v1448_v62  ;;  %v1545_v43 = vadd.f32 %v1530_v17, %v1449_v37  ;;  %v1546_v8 = vadd.f32 %v1531_v39, %v1450_v56 }
 0x243   : > { %v1453_v25 = vadd.f32 %v1437_v0, %v2620_v15  ;;  %v1454_v4 = vadd.f32 %v1438_v35, %v2634_v22  ;;  %v1455_v6 = vadd.f32 %v1439_v63, %v2612_v36 }
 0x296   : > { %v1618_v38 = vpop.xlane.xlu0 %1617 }
 0x297   : > { %v1625_v57 = vrot.slane %v1618_v38, 6  ;;  %v1626_v5 = vrot.slane %v1618_v38, 7 }
 0x299   : > { %v1622_v23 = vpop.xlane.xlu1 %1621  ;;  %v1641_v49 = vadd.f32 %v1626_v5, %v1545_v43  ;;  %v1640_v47 = vadd.f32 %v1625_v57, %v1544_v2 }
 0x29a   : > { %v1627_v7 = vrot.slane %v1622_v23, 1  ;;  %v1526_v13 = vpop.xlane.xlu0 %1525  ;;  %v1628_v12 = vrot.slane %v1622_v23, 2  ;;  %v1629_v3 = vrot.slane %v1622_v23, 3  ;;  %v1630_v19 = vrot.slane %v1622_v23, 4 }
 0x29b   : > { %v1532_v26 = vrot.slane %v1526_v13, 1  ;;  %v1533_v41 = vrot.slane %v1526_v13, 2  ;;  %v1534_v44 = vrot.slane %v1526_v13, 3  ;;  %v1535_v16 = vrot.slane %v1526_v13, 4 }
 0x29c   : > { %v1547_v60 = vadd.f32 %v1526_v13, %v1451_v9  ;;  %v1631_v18 = vrot.slane %v1622_v23, 5  ;;  %v1642_v15 = vadd.f32 %v1622_v23, %v1546_v8 }
 0x29d   : > { %v1548_v34 = vadd.f32 %v1532_v26, %v1452_v10  ;;  %v1549_v22 = vadd.f32 %v1533_v41, %v1453_v25  ;;  %v1714_v46 = vpop.xlane.xlu1 %1713  ;;  %v1550_v45 = vadd.f32 %v1534_v44, %v1454_v4  ;;  %v1551_v36 = vadd.f32 %v1535_v16, %v1455_v6 }
 0x29e   : > { %v1643_v20 = vadd.f32 %v1627_v7, %v1547_v60  ;;  %v1721_v14 = vrot.slane %v1714_v46, 7  ;;  %v1718_v55 = vpop.xlane.xlu0 %1717 }
 0x29f   : > { %v1644_v21 = vadd.f32 %v1628_v12, %v1548_v34  ;;  %v1645_v53 = vadd.f32 %v1629_v3, %v1549_v22  ;;  %v1722_v1 = vrot.slane %v1718_v55, 1  ;;  %v1723_v48 = vrot.slane %v1718_v55, 2 }
 0x2a0   : > { %v1646_v59 = vadd.f32 %v1630_v19, %v1550_v45  ;;  %v1647_v61 = vadd.f32 %v1631_v18, %v1551_v36  ;;  %v1736_v51 = vadd.f32 %v1721_v14, %v1640_v47  ;;  %v1724_v54 = vrot.slane %v1718_v55, 3 }
 0x2a1   : > { %v1725_v42 = vrot.slane %v1718_v55, 4  ;;  %v1726_v50 = vrot.slane %v1718_v55, 5  ;;  %v1727_v27 = vrot.slane %v1718_v55, 6  ;;  %v1737_v24 = vadd.f32 %v1718_v55, %v1641_v49 }
 0x2a2   : > { %v1738_v58 = vadd.f32 %v1722_v1, %v1642_v15  ;;  %v1739_v30 = vadd.f32 %v1723_v48, %v1643_v20  ;;  %v1740_v32 = vadd.f32 %v1724_v54, %v1644_v21 }
 0x2a3   : > { %v1741_v11 = vadd.f32 %v1725_v42, %v1645_v53  ;;  %v1752_v33 = vrot.slane %v1737_v24, 7  ;;  %v1742_v28 = vadd.f32 %v1726_v50, %v1646_v59  ;;  %v1743_v29 = vadd.f32 %v1727_v27, %v1647_v61 }
 0x2a4   : > { %v1754_v31 = vrot.slane %v1738_v58, 6  ;;  %v1756_v40 = vrot.slane %v1739_v30, 5  ;;  %v1758_v52 = vrot.slane %v1740_v32, 4 }
 0x2a5   : > { %v1753_v62 = vsel %vm927_vm2, %v1752_v33, %v1736_v51  ;;  %v1760_v56 = vrot.slane %v1741_v11, 3  ;;  %v1762_v0 = vrot.slane %v1742_v28, 2  ;;  %v1764_v63 = vrot.slane %v1743_v29, 1 }
 0x2a6   : > { %v1755_v37 = vsel %vm928_vm0, %v1754_v31, %v1753_v62 }
 0x2a7   : > { %v1757_v17 = vsel %vm930_vm4, %v1756_v40, %v1755_v37 }
 0x2a8   : > { %v1759_v39 = vsel %vm932_vm5, %v1758_v52, %v1757_v17 }
 0x2a9   : > { %v1761_v35 = vsel %vm934_vm6, %v1760_v56, %v1759_v39 }
 0x2aa   : > { %v1763_v38 = vsel %vm936_vm7, %v1762_v0, %v1761_v35 }
 0x2ab   : > { %v1765_v57 = vsel %vm938_vm9, %v1764_v63, %v1763_v38 }
 0x2ac   : > { %1768 = vst.msk [vmem:[%s202_s12] sm:$0xff] %vm1767_vm12, %v1765_v57 }
 0x2ad PF: > { %p17_p8 = scmp.ge.s32.totalorder %s2127_s18, 4   ;;  %s2706_s14 = smov %s2061_s15 }
 0x2ae   : > { %s2707_s15 = smov %s2065_s16  ;;  %s2708_s16 = smov %s2137_s21 }
 0x2af   : > { %s2709_s17 = smov %s2127_s18  ;;  %19 = sbr.rel (!%p17_p8) target bundleno = 7 (0x7), region = 81 }
 0x2b4   :  { %1788 = vsyncpa [#allocation5], 1 }
 0x2b5   :  { %1790 = vsyncpa [#allocation5 + $0x1], 1 }
 0x2b6   :  { %1791 = vsyncpa [#allocation7], 1 }
 0x2b7   :  { %1793 = vsyncpa [#allocation7 + $0x1], 1 }

</bundles_post_ra>
